<compile_context>
chip_gen: v6e
topology: v6e:2x2x1
jax: 0.10.0
libtpu: 0.0.40
codegen_flags: <defaults>
</compile_context>

<pallas_src>
import jax
import jax.numpy as jnp
from jax.experimental import pallas as pl
from jax.experimental.pallas import tpu as pltpu


def _round_up(x, m):
    return ((x + m - 1) // m) * m


def _pick_tile(n_pad, max_tile):
    """Largest multiple-of-128 divisor of n_pad that is <= max_tile."""
    best = 128
    for mult in range(1, max_tile // 128 + 1):
        cand = mult * 128
        if n_pad % cand == 0:
            best = cand
    return best


# ---------------------------------------------------------------------------
# Pass 1: stream A to build  d = 1/(sqrt(rowsum(A)) + 1e-10)  and the
#         pre-scaled, pre-transformed features  H = d * (X @ W^T).
# Grid: (row blocks i = parallel, col blocks k = arbitrary/reduction).
# ---------------------------------------------------------------------------
def _normalize_kernel(a_ref, x_ref, w_ref, d_ref, h_ref):
    k = pl.program_id(1)

    @pl.when(k == 0)
    def _():
        d_ref[...] = jnp.zeros_like(d_ref)

    # Partial row sums of this A tile, accumulated in f32 in the resident
    # output block (cast first so bf16 inputs accumulate exactly: A is 0/1).
    d_ref[...] += jnp.sum(a_ref[...].astype(jnp.float32), axis=1, keepdims=True)

    @pl.when(k == pl.num_programs(1) - 1)
    def _():
        # Same formula as torch: diag of inverse(sqrt(D) + 1e-10 * I).
        d = 1.0 / (jnp.sqrt(d_ref[...]) + 1e-10)
        d_ref[...] = d
        # Small matmul first (F_in -> F_out), column-side D^{-1/2} folded in.
        xw = jnp.dot(x_ref[...], w_ref[...], preferred_element_type=jnp.float32)
        h_ref[...] = (d * xw).astype(h_ref.dtype)


# ---------------------------------------------------------------------------
# Pass 2: out = relu( d_row * (A @ H) + b ), tiled (TM, TK) over A with an
#         f32 VMEM accumulator; norm_A never materialized.
# ---------------------------------------------------------------------------
def _aggregate_kernel(a_ref, h_ref, d_ref, b_ref, o_ref, acc_ref):
    k = pl.program_id(1)

    @pl.when(k == 0)
    def _():
        acc_ref[...] = jnp.zeros_like(acc_ref)

    # The only N^2-scaling matmul: contracts the graph dim, produces a
    # lane-dense (multiple-of-128) F_out.  bf16 x bf16 -> f32 accumulate.
    acc_ref[...] += jnp.dot(a_ref[...], h_ref[...],
                            preferred_element_type=jnp.float32)

    @pl.when(k == pl.num_programs(1) - 1)
    def _():
        # Row-side D^{-1/2}, bias, ReLU; unmasked multiple-of-128 store.
        o_ref[...] = jnp.maximum(d_ref[...] * acc_ref[...] + b_ref[...], 0.0)


def gcn_layer(adjacency_matrix, feature_matrix, weight, bias, *,
              use_bf16=True, tm_max=512, tk_max=1024, vmem_limit_bytes=None):
    """Pallas GCN layer forward.

    adjacency_matrix: (N, N) f32
    feature_matrix:   (N, F_in) f32
    weight:           (F_out, F_in) f32   (nn.Linear weight)
    bias:             (F_out,) f32        (nn.Linear bias)
    returns:          (N, F_out) f32
    """
    n, f_in = feature_matrix.shape
    f_out = weight.shape[0]
    compute_dtype = jnp.bfloat16 if use_bf16 else jnp.float32

    # Lane-dense feature dims (multiples of 128).
    f_in_p = _round_up(f_in, 128)
    f_out_p = _round_up(f_out, 128)

    # Graph dim padded only to 128; tiles chosen as divisors of n_pad so the
    # grid covers it exactly with no extra padding waste.
    n_pad = _round_up(n, 128)
    tm = _pick_tile(n_pad, tm_max)
    tk = _pick_tile(n_pad, tk_max)

    # Zero padding is exact: padded A rows/cols are zero, padded X rows are
    # zero, so padded nodes contribute nothing and are sliced away at the end.
    a_p = jnp.pad(adjacency_matrix.astype(compute_dtype),
                  ((0, n_pad - n), (0, n_pad - n)))
    x_p = jnp.pad(feature_matrix.astype(compute_dtype),
                  ((0, n_pad - n), (0, f_in_p - f_in)))
    wt_p = jnp.pad(weight.T.astype(compute_dtype),          # pre-transposed once
                   ((0, f_in_p - f_in), (0, f_out_p - f_out)))
    b_p = jnp.pad(bias.astype(jnp.float32).reshape(1, f_out),
                  ((0, 0), (0, f_out_p - f_out)))

    grid = (n_pad // tm, n_pad // tk)
    cp_kwargs = dict(dimension_semantics=("parallel", "arbitrary"))
    if vmem_limit_bytes is not None:
        cp_kwargs["vmem_limit_bytes"] = vmem_limit_bytes
    compiler_params = pltpu.CompilerParams(**cp_kwargs)

    # --- Pass 1: d = 1/(sqrt(deg)+eps),  H = d * (X @ W^T) ------------------
    d_inv_sqrt, h = pl.pallas_call(
        _normalize_kernel,
        out_shape=(jax.ShapeDtypeStruct((n_pad, 1), jnp.float32),
                   jax.ShapeDtypeStruct((n_pad, f_out_p), compute_dtype)),
        grid_spec=pltpu.PrefetchScalarGridSpec(
            num_scalar_prefetch=0,
            grid=grid,
            in_specs=[
                pl.BlockSpec((tm, tk), lambda i, k: (i, k)),           # A tile
                pl.BlockSpec((tm, f_in_p), lambda i, k: (i, 0)),       # X rows (resident over k)
                pl.BlockSpec((f_in_p, f_out_p), lambda i, k: (0, 0)),  # W^T (resident)
            ],
            out_specs=[
                pl.BlockSpec((tm, 1), lambda i, k: (i, 0)),            # d (accumulator)
                pl.BlockSpec((tm, f_out_p), lambda i, k: (i, 0)),      # H
            ],
        ),
        compiler_params=compiler_params,
    )(a_p, x_p, wt_p)

    # --- Pass 2: out = relu(d_row * (A @ H) + b) ----------------------------
    out_p = pl.pallas_call(
        _aggregate_kernel,
        out_shape=jax.ShapeDtypeStruct((n_pad, f_out_p), jnp.float32),
        grid_spec=pltpu.PrefetchScalarGridSpec(
            num_scalar_prefetch=0,
            grid=grid,
            in_specs=[
                pl.BlockSpec((tm, tk), lambda i, k: (i, k)),           # A tile
                pl.BlockSpec((tk, f_out_p), lambda i, k: (k, 0)),      # H cols block
                pl.BlockSpec((tm, 1), lambda i, k: (i, 0)),            # d rows
                pl.BlockSpec((1, f_out_p), lambda i, k: (0, 0)),       # bias (resident)
            ],
            out_specs=pl.BlockSpec((tm, f_out_p), lambda i, k: (i, 0)),
            scratch_shapes=[pltpu.VMEM((tm, f_out_p), jnp.float32)],
        ),
        compiler_params=compiler_params,
    )(a_p, h, d_inv_sqrt, b_p)

    return out_p[:n, :f_out]


def _reference(adj, feats, weight, bias):
    """Plain-JAX reference, same math as the torch module (f32)."""
    deg = jnp.sum(adj, axis=1)
    d = 1.0 / (jnp.sqrt(deg) + 1e-10)
    norm_a = d[:, None] * adj * d[None, :]
    return jnp.maximum(norm_a @ feats @ weight.T + bias, 0.0)


if __name__ == "__main__":
    key = jax.random.PRNGKey(0)

    test_cases = [
        (64, 32, 16),    # tiny, everything fits in one block
        (200, 40, 24),   # non-multiple shapes: exercises padding + tile picker
    ]

    for case_idx, (N, F_IN, F_OUT) in enumerate(test_cases):
        key, k_adj, k_feat, k_w, k_b = jax.random.split(key, 5)

        # Symmetric 0/1 adjacency with self-loops (degrees strictly positive).
        raw = jax.random.uniform(k_adj, (N, N))
        adj = (raw + raw.T > 1.0).astype(jnp.float32)
        adj = jnp.maximum(adj, jnp.eye(N, dtype=jnp.float32))

        feats = jax.random.normal(k_feat, (N, F_IN), dtype=jnp.float32)

        bound = 1.0 / (F_IN ** 0.5)
        weight = jax.random.uniform(k_w, (F_OUT, F_IN), minval=-bound,
                                    maxval=bound, dtype=jnp.float32)
        bias = jax.random.uniform(k_b, (F_OUT,), minval=-bound, maxval=bound,
                                  dtype=jnp.float32)

        ref = _reference(adj, feats, weight, bias)

        # Exact (f32) path.
        out_f32 = gcn_layer(adj, feats, weight, bias, use_bf16=False)
        jax.block_until_ready(out_f32)
        assert out_f32.shape == (N, F_OUT)
        assert jnp.allclose(out_f32, ref, atol=1e-3, rtol=1e-3), \
            f"f32 mismatch in case {case_idx}"

        # Fast (bf16-MXU, f32-accumulate) path.
        out_bf16 = gcn_layer(adj, feats, weight, bias, use_bf16=True)
        jax.block_until_ready(out_bf16)
        assert out_bf16.shape == (N, F_OUT)
        assert jnp.allclose(out_bf16, ref, atol=5e-2, rtol=5e-2), \
            f"bf16 mismatch in case {case_idx}"

    print("KERNEL_OK")
</pallas_src>

<mosaic_0001>
module attributes {stable_mosaic.version = 11 : i64} {
  func.func @_normalize_kernel(%arg0: i32, %arg1: i32, %arg2: memref<128x128xf32, #tpu.memory_space<vmem>>, %arg3: memref<128x128xf32, #tpu.memory_space<vmem>>, %arg4: memref<128x128xf32, #tpu.memory_space<vmem>>, %arg5: memref<128x1xf32, #tpu.memory_space<vmem>>, %arg6: memref<128x128xf32, #tpu.memory_space<vmem>>) attributes {dimension_semantics = [#tpu.dimension_semantics<parallel>, #tpu.dimension_semantics<arbitrary>], iteration_bounds = array<i64: 1, 1>, scalar_prefetch = 0 : i64, scratch_operands = 0 : i64, tpu.core_type = #tpu.core_type<tc>, window_params = [{transform_indices = @transform_0, window_bounds = array<i64: 128, 128>}, {transform_indices = @transform_1, window_bounds = array<i64: 128, 128>}, {pipeline_mode = #tpu.pipeline_mode<synchronous>, transform_indices = @transform_2, window_bounds = array<i64: 128, 128>}, {transform_indices = @transform_3, window_bounds = array<i64: 128, 1>}, {transform_indices = @transform_4, window_bounds = array<i64: 128, 128>}]} {
    %c0_i32 = arith.constant 0 : i32
    %0 = arith.cmpi eq, %arg1, %c0_i32 : i32
    %1 = arith.extui %0 : i1 to i32
    %c0_i32_0 = arith.constant 0 : i32
    %2 = arith.cmpi ne, %1, %c0_i32_0 : i32
    scf.if %2 {
      %cst_8 = arith.constant 0.000000e+00 : f32
      %12 = vector.broadcast %cst_8 : f32 to vector<128x1xf32>
      %c0_9 = arith.constant 0 : index
      %c0_10 = arith.constant 0 : index
      %13 = vector.load %arg5[%c0_9, %c0_10] : memref<128x1xf32, #tpu.memory_space<vmem>>, vector<128x1xf32>
      tpu.vector_store %arg5[%c0_9, %c0_10], %12 {strides = array<i32>} : memref<128x1xf32, #tpu.memory_space<vmem>>, vector<128x1xf32>,
    } else {
    }
    %c0 = arith.constant 0 : index
    %c0_1 = arith.constant 0 : index
    %3 = vector.load %arg5[%c0, %c0_1] : memref<128x1xf32, #tpu.memory_space<vmem>>, vector<128x1xf32>
    %c0_2 = arith.constant 0 : index
    %c0_3 = arith.constant 0 : index
    %4 = vector.load %arg2[%c0_2, %c0_3] : memref<128x128xf32, #tpu.memory_space<vmem>>, vector<128x128xf32>
    %cst = arith.constant dense<0.000000e+00> : vector<128xf32>
    %5 = vector.multi_reduction <add>, %4, %cst [1] : vector<128x128xf32> to vector<128xf32>
    %6 = vector.shape_cast %5 : vector<128xf32> to vector<128x1xf32>
    %7 = arith.addf %3, %6 : vector<128x1xf32>
    %c0_4 = arith.constant 0 : index
    %c0_5 = arith.constant 0 : index
    %8 = vector.load %arg5[%c0_4, %c0_5] : memref<128x1xf32, #tpu.memory_space<vmem>>, vector<128x1xf32>
    tpu.vector_store %arg5[%c0_4, %c0_5], %7 {strides = array<i32>} : memref<128x1xf32, #tpu.memory_space<vmem>>, vector<128x1xf32>,
    %c0_i32_6 = arith.constant 0 : i32
    %9 = arith.cmpi eq, %arg1, %c0_i32_6 : i32
    %10 = arith.extui %9 : i1 to i32
    %c0_i32_7 = arith.constant 0 : i32
    %11 = arith.cmpi ne, %10, %c0_i32_7 : i32
    scf.if %11 {
      %c0_8 = arith.constant 0 : index
      %c0_9 = arith.constant 0 : index
      %12 = vector.load %arg5[%c0_8, %c0_9] : memref<128x1xf32, #tpu.memory_space<vmem>>, vector<128x1xf32>
      %13 = math.sqrt %12 : vector<128x1xf32>
      %cst_10 = arith.constant 1.000000e-10 : f32
      %14 = vector.broadcast %cst_10 : f32 to vector<128x1xf32>
      %15 = arith.addf %13, %14 : vector<128x1xf32>
      %cst_11 = arith.constant 1.000000e+00 : f32
      %16 = vector.broadcast %cst_11 : f32 to vector<128x1xf32>
      %17 = arith.divf %16, %15 : vector<128x1xf32>
      %c0_12 = arith.constant 0 : index
      %c0_13 = arith.constant 0 : index
      %18 = vector.load %arg5[%c0_12, %c0_13] : memref<128x1xf32, #tpu.memory_space<vmem>>, vector<128x1xf32>
      tpu.vector_store %arg5[%c0_12, %c0_13], %17 {strides = array<i32>} : memref<128x1xf32, #tpu.memory_space<vmem>>, vector<128x1xf32>,
      %c0_14 = arith.constant 0 : index
      %c0_15 = arith.constant 0 : index
      %19 = vector.load %arg3[%c0_14, %c0_15] : memref<128x128xf32, #tpu.memory_space<vmem>>, vector<128x128xf32>
      %c0_16 = arith.constant 0 : index
      %c0_17 = arith.constant 0 : index
      %20 = vector.load %arg4[%c0_16, %c0_17] : memref<128x128xf32, #tpu.memory_space<vmem>>, vector<128x128xf32>
      %cst_18 = arith.constant dense<0.000000e+00> : vector<128x128xf32>
      %21 = tpu.matmul %19, %20, %cst_18 {dimension_numbers = #tpu.dot_dimension_numbers<[1], [0], [0], [1], [0, 0, 1, 1], [], []>} : vector<128x128xf32>, vector<128x128xf32>, vector<128x128xf32> -> vector<128x128xf32>
      %22 = vector.broadcast %17 : vector<128x1xf32> to vector<128x128xf32>
      %23 = arith.mulf %22, %21 : vector<128x128xf32>
      %c0_19 = arith.constant 0 : index
      %c0_20 = arith.constant 0 : index
      %24 = vector.load %arg6[%c0_19, %c0_20] : memref<128x128xf32, #tpu.memory_space<vmem>>, vector<128x128xf32>
      tpu.vector_store %arg6[%c0_19, %c0_20], %23 {strides = array<i32>} : memref<128x128xf32, #tpu.memory_space<vmem>>, vector<128x128xf32>,
    } else {
    }
    return
  }
  func.func @transform_0(%arg0: i32, %arg1: i32) -> (i32, i32) {
    %c0_i32 = arith.constant 0 : i32
    return %arg0, %arg1 : i32, i32
  }
  func.func @transform_1(%arg0: i32, %arg1: i32) -> (i32, i32) {
    %c0_i32 = arith.constant 0 : i32
    %c0_i32_0 = arith.constant 0 : i32
    return %arg0, %c0_i32 : i32, i32
  }
  func.func @transform_2(%arg0: i32, %arg1: i32) -> (i32, i32) {
    %c0_i32 = arith.constant 0 : i32
    %c0_i32_0 = arith.constant 0 : i32
    %c0_i32_1 = arith.constant 0 : i32
    return %c0_i32, %c0_i32_0 : i32, i32
  }
  func.func @transform_3(%arg0: i32, %arg1: i32) -> (i32, i32) {
    %c0_i32 = arith.constant 0 : i32
    %c0_i32_0 = arith.constant 0 : i32
    return %arg0, %c0_i32 : i32, i32
  }
  func.func @transform_4(%arg0: i32, %arg1: i32) -> (i32, i32) {
    %c0_i32 = arith.constant 0 : i32
    %c0_i32_0 = arith.constant 0 : i32
    return %arg0, %c0_i32 : i32, i32
  }
}

</mosaic_0001>

<bundles_post_ra>
// kernel: tpu_custom_call.1
= control target key start
LH: loop header
LB: loop body
LE: loop exit
PB: predicated region body
PF: predicated region fallthrough
CT: control target
= control target key end

     0   :  { %10 = vsyncpa [#allocation3], 0  ;;  %s1461_s0 = inlined_call_operand.hbm [shape: f32[128,128], index: 0, kind: input, shape index: {}]   ;;  %s1462_s1 = inlined_call_operand.hbm [shape: f32[128,128], index: 1, kind: input, shape index: {}]   ;;  %s1463_s2 = inlined_call_operand.hbm [shape: f32[128,128], index: 2, kind: input, shape index: {}]   ;;  %s1464_s3 = inlined_call_operand.vmem [shape: f32[128,1], index: 3, kind: output, shape index: {0}]   ;;  %s1465_s4 = inlined_call_operand.hbm [shape: f32[128,128], index: 4, kind: output, shape index: {1}]  }
   0x1   :  { %11 = vsyncpa [#allocation6], 0 }
   0x2   :  { %12 = vsyncpa [#allocation4], 0  ;;  %s962_s15 = smov [#allocation5]   ;;  %s963_s17 = smov [#allocation2]  }
   0x3   :  { %s30_s16 = sshll.u32 %s962_s15, 4  ;;  %s18_s18 = sshll.u32 %s963_s17, 4  ;;  %s31_s16 = int_to_ptr.vmem [resolvable:$true] %s30_s16  ;;  %s19_s18 = int_to_ptr.vmem [resolvable:$true] %s18_s18 }
   0x4   :  { %s884_s19 = scalar_lea.vmem %s31_s16, 2048  ;;  %p889_p1 = scmp.lt.s32.totalorder %s31_s16, %s31_s16 }
   0x5   :  { %p885_p0 = scmp.ne.s32.totalorder %s31_s16, %s884_s19  ;;  %p890_p2 = scmp.lt.s32.totalorder %s884_s19, %s884_s19 }
   0x7   :  { %p891_p3 = por %p890_p2, %p889_p1 }
   0x9   :  { %p892_p4 = pnand %p891_p3, %p885_p0 }
   0xb   :  { %895 = shalt.err (!%p892_p4)
}
   0xc   :  { %s964_s20 = smov 128   ;;  %s965_s21 = smov 8  }
   0xd   :  { %36 = dma.hbm_to_vmem [thread:$0]  %s1462_s1, 2048, %s31_s16, [#allocation6], %s964_s20, %s964_s20, %s965_s21  }
   0xe   :  { %s904_s24 = scalar_lea.vmem %s19_s18, 2048  ;;  %p909_p6 = scmp.lt.s32.totalorder %s19_s18, %s19_s18 }
   0xf   :  { %p905_p5 = scmp.ne.s32.totalorder %s19_s18, %s904_s24  ;;  %p910_p7 = scmp.lt.s32.totalorder %s904_s24, %s904_s24 }
  0x11   :  { %p911_p8 = por %p910_p7, %p909_p6 }
  0x13   :  { %p912_p9 = pnand %p911_p8, %p905_p5 }
  0x15   :  { %915 = shalt.err (!%p912_p9)
}
  0x16   :  { %24 = dma.hbm_to_vmem [thread:$0]  %s1461_s0, 2048, %s19_s18, [#allocation3], %s964_s20, %s964_s20, %s965_s21  }
  0x17   :  { %s966_s27 = smov [#allocation7]  }
  0x18   :  { %s42_s28 = sshll.u32 %s966_s27, 4  ;;  %s43_s28 = int_to_ptr.vmem [resolvable:$true] %s42_s28 }
  0x19   :  { %s924_s29 = scalar_lea.vmem %s43_s28, 2048  ;;  %p929_p11 = scmp.lt.s32.totalorder %s43_s28, %s43_s28 }
  0x1a   :  { %p925_p10 = scmp.ne.s32.totalorder %s43_s28, %s924_s29  ;;  %p930_p12 = scmp.lt.s32.totalorder %s924_s29, %s924_s29 }
  0x1c   :  { %p931_p13 = por %p930_p12, %p929_p11 }
  0x1e   :  { %p932_p0 = pnand %p931_p13, %p925_p10 }
  0x20   :  { %935 = shalt.err (!%p932_p0)
}
  0x21   :  { %48 = dma.hbm_to_vmem [thread:$0]  %s1463_s2, 2048, %s43_s28, [#allocation6], %s964_s20, %s964_s20, %s965_s21  }
  0x22   :  { %956 = dma.done.wait [#allocation3], 2048  }
  0x23   :  { %957 = vsyncadd [#allocation3], 4294965248 }
  0x24   :  { %958 = dma.done.wait [#allocation6], 4096  }
  0x25   :  { %959 = vsyncadd [#allocation6], 4294963200  ;;  %vm62_vm0 = vcmask 7168   ;;  %v967_v0 = vmov 0.0   ;;  %v97_v1 = vld [vmem:[#allocation2 + $0x10] sm:$0xff]  ;;  %v95_v2 = vld [vmem:[#allocation2] sm:$0xff] }
  0x26   :  { %65 = vst.msk [vmem:[%s1464_s3 + $0x10] sm:$0xff] %vm62_vm0, %v967_v0  ;;  %63 = vst.msk [vmem:[%s1464_s3] sm:$0xff] %vm62_vm0, %v967_v0  ;;  %115 = vadd.xlane.f32.xlu1 %v97_v1  ;;  %111 = vadd.xlane.f32.xlu0 %v95_v2  ;;  %v98_v3 = vld [vmem:[#allocation2 + $0x18] sm:$0xff]  ;;  %v96_v4 = vld [vmem:[#allocation2 + $0x8] sm:$0xff]  ;;  %v968_v49 = vmov 0  }
  0x27   :  { %64 = vst.msk [vmem:[%s1464_s3 + $0x8] sm:$0xff] %vm62_vm0, %v967_v0  ;;  %66 = vst.msk [vmem:[%s1464_s3 + $0x18] sm:$0xff] %vm62_vm0, %v967_v0  ;;  %v402_v5 = vld [vmem:[#allocation7 + $0x78] sm:$0xff]  ;;  %v401_v6 = vld [vmem:[#allocation7 + $0x70] sm:$0xff]  ;;  %810 = vset.pattern.permute.xlu0 %v968_v49  ;;  %811 = vset.pattern.permute.xlu1 %v968_v49 }
  0x28   :  { %67 = vst.msk [vmem:[%s1464_s3 + $0x20] sm:$0xff] %vm62_vm0, %v967_v0  ;;  %68 = vst.msk [vmem:[%s1464_s3 + $0x28] sm:$0xff] %vm62_vm0, %v967_v0  ;;  %v100_v7 = vld [vmem:[#allocation2 + $0x28] sm:$0xff]  ;;  %v99_v8 = vld [vmem:[#allocation2 + $0x20] sm:$0xff]  ;;  %714 = vmatprep.subr.mxu0 %v402_v5  ;;  %770 = vmatprep.subr.mxu1 %v402_v5 }
  0x29   :  { %69 = vst.msk [vmem:[%s1464_s3 + $0x30] sm:$0xff] %vm62_vm0, %v967_v0  ;;  %70 = vst.msk [vmem:[%s1464_s3 + $0x38] sm:$0xff] %vm62_vm0, %v967_v0  ;;  %715 = vmatpush3.msra.mxu0 %v402_v5  ;;  %786 = vmatpush3.msra.mxu1 %v402_v5  ;;  %v400_v9 = vld [vmem:[#allocation7 + $0x68] sm:$0xff]  ;;  %v102_v10 = vld [vmem:[#allocation2 + $0x38] sm:$0xff] }
  0x2a   :  { %71 = vst.msk [vmem:[%s1464_s3 + $0x40] sm:$0xff] %vm62_vm0, %v967_v0  ;;  %72 = vst.msk [vmem:[%s1464_s3 + $0x48] sm:$0xff] %vm62_vm0, %v967_v0  ;;  %117 = vadd.xlane.f32.xlu1 %v98_v3  ;;  %113 = vadd.xlane.f32.xlu0 %v96_v4  ;;  %v101_v11 = vld [vmem:[#allocation2 + $0x30] sm:$0xff]  ;;  %v399_v12 = vld [vmem:[#allocation7 + $0x60] sm:$0xff] }
  0x2b   :  { %73 = vst.msk [vmem:[%s1464_s3 + $0x50] sm:$0xff] %vm62_vm0, %v967_v0  ;;  %74 = vst.msk [vmem:[%s1464_s3 + $0x58] sm:$0xff] %vm62_vm0, %v967_v0  ;;  %716 = vmatprep.subr.mxu0 %v401_v6  ;;  %771 = vmatprep.subr.mxu1 %v401_v6  ;;  %v398_v13 = vld [vmem:[#allocation7 + $0x58] sm:$0xff]  ;;  %v104_v14 = vld [vmem:[#allocation2 + $0x48] sm:$0xff] }
  0x2c   :  { %75 = vst.msk [vmem:[%s1464_s3 + $0x60] sm:$0xff] %vm62_vm0, %v967_v0  ;;  %76 = vst.msk [vmem:[%s1464_s3 + $0x68] sm:$0xff] %vm62_vm0, %v967_v0  ;;  %717 = vmatpush3.msra.mxu0 %v401_v6  ;;  %787 = vmatpush3.msra.mxu1 %v401_v6  ;;  %v103_v15 = vld [vmem:[#allocation2 + $0x40] sm:$0xff]  ;;  %v397_v16 = vld [vmem:[#allocation7 + $0x50] sm:$0xff] }
  0x2d   :  { %77 = vst.msk [vmem:[%s1464_s3 + $0x70] sm:$0xff] %vm62_vm0, %v967_v0  ;;  %78 = vst.msk [vmem:[%s1464_s3 + $0x78] sm:$0xff] %vm62_vm0, %v967_v0  ;;  %718 = vmatprep.subr.mxu0 %v400_v9  ;;  %772 = vmatprep.subr.mxu1 %v400_v9  ;;  %v106_v17 = vld [vmem:[#allocation2 + $0x58] sm:$0xff]  ;;  %v105_v18 = vld [vmem:[#allocation2 + $0x50] sm:$0xff] }
  0x2e   :  { %121 = vadd.xlane.f32.xlu1 %v100_v7  ;;  %119 = vadd.xlane.f32.xlu0 %v99_v8  ;;  %v396_v19 = vld [vmem:[#allocation7 + $0x48] sm:$0xff]  ;;  %v395_v20 = vld [vmem:[#allocation7 + $0x40] sm:$0xff]  ;;  %v394_v24 = vld [vmem:[#allocation7 + $0x38] sm:$0xff] }
  0x2f   :  { %719 = vmatpush3.msra.mxu0 %v400_v9  ;;  %788 = vmatpush3.msra.mxu1 %v400_v9  ;;  %v371_v21 = vld [vmem:[#allocation5] sm:$0xff]  ;;  %v108_v22 = vld [vmem:[#allocation2 + $0x68] sm:$0xff]  ;;  %v110_v25 = vld [vmem:[#allocation2 + $0x78] sm:$0xff] }
  0x30   :  { %720 = vmatprep.subr.mxu0 %v399_v12  ;;  %773 = vmatprep.subr.mxu1 %v399_v12  ;;  %v107_v23 = vld [vmem:[#allocation2 + $0x60] sm:$0xff]  ;;  %v109_v26 = vld [vmem:[#allocation2 + $0x70] sm:$0xff]  ;;  %v392_v28 = vld [vmem:[#allocation7 + $0x28] sm:$0xff] }
  0x31   :  { %721 = vmatpush3.msra.mxu0 %v399_v12  ;;  %789 = vmatpush3.msra.mxu1 %v399_v12  ;;  %v393_v27 = vld [vmem:[#allocation7 + $0x30] sm:$0xff]  ;;  %v391_v29 = vld [vmem:[#allocation7 + $0x20] sm:$0xff]  ;;  %v390_v30 = vld [vmem:[#allocation7 + $0x18] sm:$0xff] }
  0x32   :  { %125 = vadd.xlane.f32.xlu1 %v102_v10  ;;  %123 = vadd.xlane.f32.xlu0 %v101_v11  ;;  %v389_v31 = vld [vmem:[#allocation7 + $0x10] sm:$0xff]  ;;  %v388_v32 = vld [vmem:[#allocation7 + $0x8] sm:$0xff]  ;;  %v387_v33 = vld [vmem:[#allocation7] sm:$0xff] }
  0x33   :  { %722 = vmatprep.subr.mxu0 %v398_v13  ;;  %774 = vmatprep.subr.mxu1 %v398_v13  ;;  %v372_v34 = vld [vmem:[#allocation5 + $0x8] sm:$0xff]  ;;  %v373_v35 = vld [vmem:[#allocation5 + $0x10] sm:$0xff]  ;;  %v379_v36 = vld [vmem:[#allocation5 + $0x40] sm:$0xff] }
  0x34   :  { %723 = vmatpush3.msra.mxu0 %v398_v13  ;;  %790 = vmatpush3.msra.mxu1 %v398_v13  ;;  %v380_v37 = vld [vmem:[#allocation5 + $0x48] sm:$0xff]  ;;  %v381_v38 = vld [vmem:[#allocation5 + $0x50] sm:$0xff]  ;;  %v374_v39 = vld [vmem:[#allocation5 + $0x18] sm:$0xff] }
  0x35   :  { %724 = vmatprep.subr.mxu0 %v397_v16  ;;  %775 = vmatprep.subr.mxu1 %v397_v16  ;;  %v375_v40 = vld [vmem:[#allocation5 + $0x20] sm:$0xff]  ;;  %v382_v41 = vld [vmem:[#allocation5 + $0x58] sm:$0xff]  ;;  %v376_v43 = vld [vmem:[#allocation5 + $0x28] sm:$0xff] }
  0x36   :  { %129 = vadd.xlane.f32.xlu1 %v104_v14  ;;  %127 = vadd.xlane.f32.xlu0 %v103_v15  ;;  %v383_v42 = vld [vmem:[#allocation5 + $0x60] sm:$0xff]  ;;  %v377_v44 = vld [vmem:[#allocation5 + $0x30] sm:$0xff]  ;;  %v384_v45 = vld [vmem:[#allocation5 + $0x68] sm:$0xff] }
  0x37   :  { %725 = vmatpush3.msra.mxu0 %v397_v16  ;;  %791 = vmatpush3.msra.mxu1 %v397_v16  ;;  %v385_v46 = vld [vmem:[#allocation5 + $0x70] sm:$0xff]  ;;  %v378_v47 = vld [vmem:[#allocation5 + $0x38] sm:$0xff]  ;;  %v79_v51 = vld [vmem:[%s1464_s3] sm:$0xff] }
  0x38   :  { %726 = vmatprep.subr.mxu0 %v396_v19  ;;  %776 = vmatprep.subr.mxu1 %v396_v19  ;;  %v386_v48 = vld [vmem:[#allocation5 + $0x78] sm:$0xff]  ;;  %v81_v50 = vld [vmem:[%s1464_s3 + $0x10] sm:$0xff]  ;;  %v80_v57 = vld [vmem:[%s1464_s3 + $0x8] sm:$0xff] }
  0x39   :  { %727 = vmatpush3.msra.mxu0 %v396_v19  ;;  %792 = vmatpush3.msra.mxu1 %v396_v19  ;;  %v82_v56 = vld [vmem:[%s1464_s3 + $0x18] sm:$0xff]  ;;  %v84_v62 = vld [vmem:[%s1464_s3 + $0x28] sm:$0xff]  ;;  %v83_v63 = vld [vmem:[%s1464_s3 + $0x20] sm:$0xff] }
  0x3a   :  { %133 = vadd.xlane.f32.xlu1 %v106_v17  ;;  %131 = vadd.xlane.f32.xlu0 %v105_v18  ;;  %v86_v4 = vld [vmem:[%s1464_s3 + $0x38] sm:$0xff]  ;;  %v85_v7 = vld [vmem:[%s1464_s3 + $0x30] sm:$0xff]  ;;  %v88_v12 = vld [vmem:[%s1464_s3 + $0x48] sm:$0xff] }
  0x3b   :  { %728 = vmatprep.subr.mxu0 %v395_v20  ;;  %746 = vmatprep.mubr.f32.mxu0 %v371_v21  ;;  %v87_v15 = vld [vmem:[%s1464_s3 + $0x40] sm:$0xff] }
  0x3c   :  { %729 = vmatpush3.msra.mxu0 %v395_v20  ;;  %777 = vmatprep.subr.mxu1 %v395_v20 }
  0x3d   :  { %730 = vmatprep.subr.mxu0 %v394_v24  ;;  %793 = vmatpush3.msra.mxu1 %v395_v20  ;;  %v90_v20 = vld [vmem:[%s1464_s3 + $0x58] sm:$0xff] }
  0x3e   :  { %137 = vadd.xlane.f32.xlu1 %v108_v22  ;;  %135 = vadd.xlane.f32.xlu0 %v107_v23  ;;  %v89_v23 = vld [vmem:[%s1464_s3 + $0x50] sm:$0xff] }
  0x3f   :  { %731 = vmatpush3.msra.mxu0 %v394_v24  ;;  %778 = vmatprep.subr.mxu1 %v394_v24 }
  0x40   :  { %732 = vmatprep.subr.mxu0 %v393_v27  ;;  %794 = vmatpush3.msra.mxu1 %v394_v24 }
  0x41   :  { %733 = vmatpush3.msra.mxu0 %v393_v27  ;;  %779 = vmatprep.subr.mxu1 %v393_v27 }
  0x42   :  { %141 = vadd.xlane.f32.xlu1 %v110_v25  ;;  %139 = vadd.xlane.f32.xlu0 %v109_v26 }
  0x43   :  { %734 = vmatprep.subr.mxu0 %v392_v28  ;;  %795 = vmatpush3.msra.mxu1 %v393_v27 }
  0x44   :  { %735 = vmatpush3.msra.mxu0 %v392_v28  ;;  %780 = vmatprep.subr.mxu1 %v392_v28 }
  0x45   :  { %736 = vmatprep.subr.mxu0 %v391_v29  ;;  %796 = vmatpush3.msra.mxu1 %v392_v28  ;;  %v92_v28 = vld [vmem:[%s1464_s3 + $0x68] sm:$0xff] }
  0x46   :  { %737 = vmatpush3.msra.mxu0 %v391_v29  ;;  %781 = vmatprep.subr.mxu1 %v391_v29 }
  0x47   :  { %738 = vmatprep.subr.mxu0 %v390_v30  ;;  %797 = vmatpush3.msra.mxu1 %v391_v29 }
  0x48   :  { %739 = vmatpush3.msra.mxu0 %v390_v30  ;;  %782 = vmatprep.subr.mxu1 %v390_v30 }
  0x49   :  { %740 = vmatprep.subr.mxu0 %v389_v31  ;;  %798 = vmatpush3.msra.mxu1 %v390_v30 }
  0x4a   :  { %741 = vmatpush3.msra.mxu0 %v389_v31  ;;  %783 = vmatprep.subr.mxu1 %v389_v31 }
  0x4b   :  { %742 = vmatprep.subr.mxu0 %v388_v32  ;;  %799 = vmatpush3.msra.mxu1 %v389_v31  ;;  %v91_v31 = vld [vmem:[%s1464_s3 + $0x60] sm:$0xff] }
  0x4c   :  { %743 = vmatpush3.msra.mxu0 %v388_v32  ;;  %784 = vmatprep.subr.mxu1 %v388_v32 }
  0x4d   :  { %744 = vmatprep.subr.mxu0 %v387_v33  ;;  %800 = vmatpush3.msra.mxu1 %v388_v32 }
  0x4e   :  { %745 = vmatpush3.msra.mxu0 %v387_v33  ;;  %785 = vmatprep.subr.mxu1 %v387_v33 }
  0x4f   :  { %747 = vmatmul.mubr.f32.vlgmr.msra.gmra.mxu0 %v372_v34  ;;  %801 = vmatpush3.msra.mxu1 %v387_v33 }
  0x50   :  { %749 = vmatprep.mubr.f32.mxu0 %v373_v35  ;;  %758 = vmatprep.mubr.f32.mxu1 %v379_v36 }
  0x51   :  { %759 = vmatmul.mubr.f32.vlgmr.msra.gmra.mxu1 %v380_v37 }
  0x52   :  { %761 = vmatprep.mubr.f32.mxu1 %v381_v38 }
  0x53   :  { %750 = vmatmul.mubr.f32.gmra.mxu0 %v374_v39 }
  0x54   :  { %752 = vmatprep.mubr.f32.mxu0 %v375_v40 }
  0x55   :  { %762 = vmatmul.mubr.f32.gmra.mxu1 %v382_v41 }
  0x56   :  { %764 = vmatprep.mubr.f32.mxu1 %v383_v42 }
  0x57   :  { %753 = vmatmul.mubr.f32.gmra.mxu0 %v376_v43 }
  0x58   :  { %755 = vmatprep.mubr.f32.mxu0 %v377_v44 }
  0x59   :  { %765 = vmatmul.mubr.f32.gmra.mxu1 %v384_v45 }
  0x5a   :  { %767 = vmatprep.mubr.f32.mxu1 %v385_v46 }
  0x5b   :  { %756 = vmatmul.mubr.f32.gmra.mxu0 %v378_v47 }
  0x5d   :  { %768 = vmatmul.mubr.f32.gmra.mxu1 %v386_v48 }
  0xaf   :  { %v116_v52 = vpop.xlane.xlu1 %115  ;;  %v112_v53 = vpop.xlane.xlu0 %111 }
  0xb0   :  { %v145_v54 = vadd.f32 %v116_v52, %v81_v50  ;;  %v143_v55 = vadd.f32 %v112_v53, %v79_v51 }
  0xb2   :  { %162 = vst.msk [vmem:[%s1464_s3 + $0x10] sm:$0xff] %vm62_vm0, %v145_v54  ;;  %160 = vst.msk [vmem:[%s1464_s3] sm:$0xff] %vm62_vm0, %v143_v55 }
  0xb3   :  { %v118_v58 = vpop.xlane.xlu1 %117  ;;  %v114_v59 = vpop.xlane.xlu0 %113 }
  0xb4   :  { %v146_v60 = vadd.f32 %v118_v58, %v82_v56  ;;  %v144_v61 = vadd.f32 %v114_v59, %v80_v57 }
  0xb6   :  { %163 = vst.msk [vmem:[%s1464_s3 + $0x18] sm:$0xff] %vm62_vm0, %v146_v60  ;;  %161 = vst.msk [vmem:[%s1464_s3 + $0x8] sm:$0xff] %vm62_vm0, %v144_v61 }
  0xb7   :  { %v122_v0 = vpop.xlane.xlu1 %121  ;;  %v120_v1 = vpop.xlane.xlu0 %119 }
  0xb8   :  { %v148_v2 = vadd.f32 %v122_v0, %v84_v62  ;;  %v147_v3 = vadd.f32 %v120_v1, %v83_v63 }
  0xb9   :  { %v1117_v5 = vld [vmem:[%s1464_s3 + $0x10] sm:$0xff]  ;;  %v1122_v6 = vld [vmem:[%s1464_s3] sm:$0xff] }
  0xba   :  { %812 = vrsqrt.f32 %v1117_v5  ;;  %165 = vst.msk [vmem:[%s1464_s3 + $0x28] sm:$0xff] %vm62_vm0, %v148_v2  ;;  %164 = vst.msk [vmem:[%s1464_s3 + $0x20] sm:$0xff] %vm62_vm0, %v147_v3  ;;  %vm211_vm1 = vcmp.eq.f32.partialorder %v1117_v5, inf  ;;  %vm213_vm2 = vcmp.eq.f32.partialorder %v1117_v5, 0.0  ;;  %v214_v32 = vand.u32 2147483648, %v1117_v5 }
  0xbb   :  { %814 = vrsqrt.f32 %v1122_v6  ;;  %v126_v8 = vpop.xlane.xlu1 %125  ;;  %v124_v9 = vpop.xlane.xlu0 %123  ;;  %vm197_vm3 = vcmp.eq.f32.partialorder %v1122_v6, inf  ;;  %vm199_vm4 = vcmp.eq.f32.partialorder %v1122_v6, 0.0  ;;  %v200_v34 = vand.u32 2147483648, %v1122_v6 }
  0xbc   :  { %v150_v10 = vadd.f32 %v126_v8, %v86_v4  ;;  %v149_v11 = vadd.f32 %v124_v9, %v85_v7 }
  0xbd   :  { %v1143_v13 = vld [vmem:[%s1464_s3 + $0x18] sm:$0xff]  ;;  %v1148_v14 = vld [vmem:[%s1464_s3 + $0x8] sm:$0xff] }
  0xbe   :  { %816 = vrsqrt.f32 %v1143_v13  ;;  %167 = vst.msk [vmem:[%s1464_s3 + $0x38] sm:$0xff] %vm62_vm0, %v150_v10  ;;  %166 = vst.msk [vmem:[%s1464_s3 + $0x30] sm:$0xff] %vm62_vm0, %v149_v11  ;;  %vm218_vm5 = vcmp.eq.f32.partialorder %v1143_v13, inf  ;;  %vm220_vm6 = vcmp.eq.f32.partialorder %v1143_v13, 0.0  ;;  %v221_v39 = vand.u32 2147483648, %v1143_v13 }
  0xbf   :  { %818 = vrsqrt.f32 %v1148_v14  ;;  %v130_v16 = vpop.xlane.xlu1 %129  ;;  %v128_v17 = vpop.xlane.xlu0 %127  ;;  %vm204_vm7 = vcmp.eq.f32.partialorder %v1148_v14, inf  ;;  %vm206_vm8 = vcmp.eq.f32.partialorder %v1148_v14, 0.0  ;;  %v207_v43 = vand.u32 2147483648, %v1148_v14 }
  0xc0   :  { %v152_v18 = vadd.f32 %v130_v16, %v88_v12  ;;  %v151_v19 = vadd.f32 %v128_v17, %v87_v15 }
  0xc1   :  { %v1169_v21 = vld [vmem:[%s1464_s3 + $0x28] sm:$0xff]  ;;  %v1174_v22 = vld [vmem:[%s1464_s3 + $0x20] sm:$0xff] }
  0xc2   :  { %820 = vrsqrt.f32 %v1169_v21  ;;  %169 = vst.msk [vmem:[%s1464_s3 + $0x48] sm:$0xff] %vm62_vm0, %v152_v18  ;;  %168 = vst.msk [vmem:[%s1464_s3 + $0x40] sm:$0xff] %vm62_vm0, %v151_v19  ;;  %vm232_vm9 = vcmp.eq.f32.partialorder %v1169_v21, inf  ;;  %vm234_vm10 = vcmp.eq.f32.partialorder %v1169_v21, 0.0  ;;  %v235_v50 = vand.u32 2147483648, %v1169_v21 }
  0xc3   :  { %822 = vrsqrt.f32 %v1174_v22  ;;  %v134_v24 = vpop.xlane.xlu1 %133  ;;  %v132_v25 = vpop.xlane.xlu0 %131  ;;  %vm225_vm11 = vcmp.eq.f32.partialorder %v1174_v22, inf  ;;  %vm227_vm12 = vcmp.eq.f32.partialorder %v1174_v22, 0.0  ;;  %v228_v57 = vand.u32 2147483648, %v1174_v22 }
  0xc4   :  { %v154_v26 = vadd.f32 %v134_v24, %v90_v20  ;;  %v153_v27 = vadd.f32 %v132_v25, %v89_v23  ;;  %v94_v23 = vld [vmem:[%s1464_s3 + $0x78] sm:$0xff]  ;;  %v93_v25 = vld [vmem:[%s1464_s3 + $0x70] sm:$0xff] }
  0xc5   :  { %v1197_v29 = vld [vmem:[%s1464_s3 + $0x38] sm:$0xff]  ;;  %v1202_v30 = vld [vmem:[%s1464_s3 + $0x30] sm:$0xff] }
  0xc6   :  { %824 = vrsqrt.f32 %v1197_v29  ;;  %171 = vst.msk [vmem:[%s1464_s3 + $0x58] sm:$0xff] %vm62_vm0, %v154_v26  ;;  %170 = vst.msk [vmem:[%s1464_s3 + $0x50] sm:$0xff] %vm62_vm0, %v153_v27  ;;  %vm246_vm13 = vcmp.eq.f32.partialorder %v1197_v29, inf  ;;  %vm248_vm14 = vcmp.eq.f32.partialorder %v1197_v29, 0.0  ;;  %v249_v0 = vand.u32 2147483648, %v1197_v29 }
  0xc7   :  { %v813_v33 = vpop.eup %812  ;;  %826 = vrsqrt.f32 %v1202_v30  ;;  %v138_v35 = vpop.xlane.xlu1 %137  ;;  %vm239_vm15 = vcmp.eq.f32.partialorder %v1202_v30, inf  ;;  %v242_v9 = vand.u32 2147483648, %v1202_v30 }
  0xc8   :  { %v136_v36 = vpop.xlane.xlu0 %135  ;;  %v815_v37 = vpop.eup %814  ;;  %v210_v38 = vmul.f32 %v813_v33, %v1117_v5  ;;  %v156_v40 = vadd.f32 %v138_v35, %v92_v28 }
  0xc9   :  { %v155_v41 = vadd.f32 %v136_v36, %v91_v31  ;;  %v196_v42 = vmul.f32 %v815_v37, %v1122_v6  ;;  %v1232_v44 = vld [vmem:[%s1464_s3 + $0x48] sm:$0xff]  ;;  %v1237_v45 = vld [vmem:[%s1464_s3 + $0x40] sm:$0xff] }
  0xca   :  { %v212_v46 = vsel %vm211_vm1, %v1117_v5, %v210_v38  ;;  %828 = vrsqrt.f32 %v1232_v44  ;;  %173 = vst.msk [vmem:[%s1464_s3 + $0x68] sm:$0xff] %vm62_vm0, %v156_v40  ;;  %vm241_vm1 = vcmp.eq.f32.partialorder %v1202_v30, 0.0  ;;  %v263_v19 = vand.u32 2147483648, %v1232_v44 }
  0xcb   :  { %172 = vst.msk [vmem:[%s1464_s3 + $0x60] sm:$0xff] %vm62_vm0, %v155_v41  ;;  %v817_v47 = vpop.eup %816  ;;  %v215_v48 = vsel %vm213_vm2, %v214_v32, %v212_v46  ;;  %v198_v49 = vsel %vm197_vm3, %v1122_v6, %v196_v42  ;;  %830 = vrsqrt.f32 %v1237_v45  ;;  %vm260_vm2 = vcmp.eq.f32.partialorder %v1232_v44, inf }
  0xcc   :  { %v819_v51 = vpop.eup %818  ;;  %v309_v52 = vadd.f32 1e-10, %v215_v48  ;;  %v201_v53 = vsel %vm199_vm4, %v200_v34, %v198_v49  ;;  %v217_v54 = vmul.f32 %v817_v47, %v1143_v13  ;;  %vm262_vm3 = vcmp.eq.f32.partialorder %v1232_v44, 0.0  ;;  %v140_v24 = vpop.xlane.xlu0 %139 }
  0xcd   :  { %v307_v55 = vadd.f32 1e-10, %v201_v53  ;;  %v203_v56 = vmul.f32 %v819_v51, %v1148_v14  ;;  %v1270_v58 = vld [vmem:[%s1464_s3 + $0x58] sm:$0xff]  ;;  %v1280_v60 = vld [vmem:[%s1464_s3 + $0x50] sm:$0xff]  ;;  %vm253_vm4 = vcmp.eq.f32.partialorder %v1237_v45, inf  ;;  %v256_v31 = vand.u32 2147483648, %v1237_v45 }
  0xce   :  { %832 = vrcp.f32 %v309_v52  ;;  %v219_v59 = vsel %vm218_vm5, %v1143_v13, %v217_v54  ;;  %vm255_vm5 = vcmp.eq.f32.partialorder %v1237_v45, 0.0  ;;  %v157_v38 = vadd.f32 %v140_v24, %v93_v25 }
  0xcf   :  { %v821_v61 = vpop.eup %820  ;;  %834 = vrcp.f32 %v307_v55  ;;  %v222_v62 = vsel %vm220_vm6, %v221_v39, %v219_v59  ;;  %v205_v63 = vsel %vm204_vm7, %v1148_v14, %v203_v56  ;;  %vm274_vm6 = vcmp.eq.f32.partialorder %v1270_v58, inf }
  0xd0   :  { %v823_v1 = vpop.eup %822  ;;  %v310_v2 = vadd.f32 1e-10, %v222_v62  ;;  %v208_v3 = vsel %vm206_vm8, %v207_v43, %v205_v63  ;;  %v231_v4 = vmul.f32 %v821_v61, %v1169_v21  ;;  %836 = vrsqrt.f32 %v1270_v58  ;;  %174 = vst.msk [vmem:[%s1464_s3 + $0x70] sm:$0xff] %vm62_vm0, %v157_v38 }
  0xd1   :  { %v308_v5 = vadd.f32 1e-10, %v208_v3  ;;  %v224_v6 = vmul.f32 %v823_v1, %v1174_v22  ;;  %838 = vrsqrt.f32 %v1280_v60  ;;  %v1298_v7 = vld [vmem:[%s1464_s3 + $0x68] sm:$0xff]  ;;  %vm276_vm7 = vcmp.eq.f32.partialorder %v1270_v58, 0.0 }
  0xd2   :  { %840 = vrcp.f32 %v310_v2  ;;  %v233_v8 = vsel %vm232_vm9, %v1169_v21, %v231_v4  ;;  %v1321_v20 = vld [vmem:[%s1464_s3 + $0x60] sm:$0xff]  ;;  %v277_v48 = vand.u32 2147483648, %v1270_v58  ;;  %vm267_vm8 = vcmp.eq.f32.partialorder %v1280_v60, inf }
  0xd3   :  { %v825_v10 = vpop.eup %824  ;;  %842 = vrcp.f32 %v308_v5  ;;  %v236_v11 = vsel %vm234_vm10, %v235_v50, %v233_v8  ;;  %v226_v12 = vsel %vm225_vm11, %v1174_v22, %v224_v6  ;;  %v142_v22 = vpop.xlane.xlu1 %141  ;;  %vm269_vm9 = vcmp.eq.f32.partialorder %v1280_v60, 0.0 }
  0xd4   :  { %v827_v13 = vpop.eup %826  ;;  %v312_v14 = vadd.f32 1e-10, %v236_v11  ;;  %v229_v15 = vsel %vm227_vm12, %v228_v57, %v226_v12  ;;  %v245_v16 = vmul.f32 %v825_v10, %v1197_v29  ;;  %844 = vrsqrt.f32 %v1298_v7 }
  0xd5   :  { %v311_v17 = vadd.f32 1e-10, %v229_v15  ;;  %v238_v18 = vmul.f32 %v827_v13, %v1202_v30  ;;  %vm288_vm10 = vcmp.eq.f32.partialorder %v1298_v7, inf  ;;  %v291_v59 = vand.u32 2147483648, %v1298_v7 }
  0xd6   :  { %846 = vrcp.f32 %v312_v14  ;;  %v247_v21 = vsel %vm246_vm13, %v1197_v29, %v245_v16  ;;  %v158_v29 = vadd.f32 %v142_v22, %v94_v23  ;;  %vm290_vm11 = vcmp.eq.f32.partialorder %v1298_v7, 0.0 }
  0xd7   :  { %v829_v26 = vpop.eup %828  ;;  %848 = vrcp.f32 %v311_v17  ;;  %v250_v27 = vsel %vm248_vm14, %v249_v0, %v247_v21  ;;  %v240_v28 = vsel %vm239_vm15, %v1202_v30, %v238_v18  ;;  %vm281_vm12 = vcmp.eq.f32.partialorder %v1321_v20, inf }
  0xd8   :  { %v831_v32 = vpop.eup %830  ;;  %v314_v33 = vadd.f32 1e-10, %v250_v27  ;;  %v243_v34 = vsel %vm241_vm1, %v242_v9, %v240_v28  ;;  %v259_v35 = vmul.f32 %v829_v26, %v1232_v44  ;;  %850 = vrsqrt.f32 %v1321_v20  ;;  %175 = vst.msk [vmem:[%s1464_s3 + $0x78] sm:$0xff] %vm62_vm0, %v158_v29 }
  0xd9   :  { %v313_v36 = vadd.f32 1e-10, %v243_v34  ;;  %v252_v37 = vmul.f32 %v831_v32, %v1237_v45  ;;  %v284_v6 = vand.u32 2147483648, %v1321_v20  ;;  %vm283_vm13 = vcmp.eq.f32.partialorder %v1321_v20, 0.0 }
  0xda   :  { %852 = vrcp.f32 %v314_v33  ;;  %v261_v39 = vsel %vm260_vm2, %v1232_v44, %v259_v35 }
  0xdb   :  { %v833_v40 = vpop.eup %832  ;;  %854 = vrcp.f32 %v313_v36  ;;  %v264_v30 = vsel %vm262_vm3, %v263_v19, %v261_v39  ;;  %v254_v41 = vsel %vm253_vm4, %v1237_v45, %v252_v37  ;;  %v270_v45 = vand.u32 2147483648, %v1280_v60 }
  0xdc   :  { %v835_v42 = vpop.eup %834  ;;  %357 = vst.msk [vmem:[%s1464_s3 + $0x10] sm:$0xff] %vm62_vm0, %v833_v40  ;;  %v316_v43 = vadd.f32 1e-10, %v264_v30  ;;  %v257_v44 = vsel %vm255_vm5, %v256_v31, %v254_v41 }
  0xdd   :  { %v837_v46 = vpop.eup %836  ;;  %355 = vst.msk [vmem:[%s1464_s3] sm:$0xff] %vm62_vm0, %v835_v42  ;;  %v315_v47 = vadd.f32 1e-10, %v257_v44  ;;  %550 = vperm.xlu0 %810, %v835_v42  }
  0xde   :  { %v839_v49 = vpop.eup %838  ;;  %856 = vrcp.f32 %v316_v43  ;;  %v273_v50 = vmul.f32 %v837_v46, %v1270_v58 }
  0xdf   :  { %v841_v51 = vpop.eup %840  ;;  %858 = vrcp.f32 %v315_v47  ;;  %v266_v52 = vmul.f32 %v839_v49, %v1280_v60  ;;  %v194_v0 = vld [vmem:[%s1464_s3 + $0x78] sm:$0xff] }
  0xe0   :  { %v843_v53 = vpop.eup %842  ;;  %358 = vst.msk [vmem:[%s1464_s3 + $0x18] sm:$0xff] %vm62_vm0, %v841_v51  ;;  %v275_v54 = vsel %vm274_vm6, %v1270_v58, %v273_v50  ;;  %860 = vrsqrt.f32 %v194_v0  ;;  %vm302_vm14 = vcmp.eq.f32.partialorder %v194_v0, inf  ;;  %v305_v17 = vand.u32 2147483648, %v194_v0 }
  0xe1   :  { %v845_v55 = vpop.eup %844  ;;  %356 = vst.msk [vmem:[%s1464_s3 + $0x8] sm:$0xff] %vm62_vm0, %v843_v53  ;;  %v278_v56 = vsel %vm276_vm7, %v277_v48, %v275_v54  ;;  %v268_v57 = vsel %vm267_vm8, %v1280_v60, %v266_v52  ;;  %555 = vperm.xlu1 %811, %v843_v53   ;;  %v193_v60 = vld [vmem:[%s1464_s3 + $0x70] sm:$0xff]  ;;  %vm304_vm15 = vcmp.eq.f32.partialorder %v194_v0, 0.0 }
  0xe2   :  { %v318_v61 = vadd.f32 1e-10, %v278_v56  ;;  %v271_v62 = vsel %vm269_vm9, %v270_v45, %v268_v57  ;;  %v287_v63 = vmul.f32 %v845_v55, %v1298_v7  ;;  %vm295_vm1 = vcmp.eq.f32.partialorder %v193_v60, inf }
  0xe3   :  { %v847_v1 = vpop.eup %846  ;;  %v317_v58 = vadd.f32 1e-10, %v271_v62  ;;  %v298_v23 = vand.u32 2147483648, %v193_v60  ;;  %vm297_vm2 = vcmp.eq.f32.partialorder %v193_v60, 0.0 }
  0xe4   :  { %v849_v2 = vpop.eup %848  ;;  %360 = vst.msk [vmem:[%s1464_s3 + $0x28] sm:$0xff] %vm62_vm0, %v847_v1  ;;  %862 = vrcp.f32 %v318_v61  ;;  %v289_v3 = vsel %vm288_vm10, %v1298_v7, %v287_v63 }
  0xe5   :  { %v851_v4 = vpop.eup %850  ;;  %359 = vst.msk [vmem:[%s1464_s3 + $0x20] sm:$0xff] %vm62_vm0, %v849_v2  ;;  %864 = vrcp.f32 %v317_v58  ;;  %v292_v5 = vsel %vm290_vm11, %v291_v59, %v289_v3  ;;  %560 = vperm.xlu1 %811, %v833_v40  }
  0xe6   :  { %v320_v8 = vadd.f32 1e-10, %v292_v5  ;;  %v280_v9 = vmul.f32 %v851_v4, %v1321_v20  ;;  %866 = vrsqrt.f32 %v193_v60 }
  0xe7   :  { %v853_v7 = vpop.eup %852 }
  0xe8   :  { %v855_v10 = vpop.eup %854  ;;  %362 = vst.msk [vmem:[%s1464_s3 + $0x38] sm:$0xff] %vm62_vm0, %v853_v7  ;;  %868 = vrcp.f32 %v320_v8  ;;  %v282_v11 = vsel %vm281_vm12, %v1321_v20, %v280_v9 }
  0xe9   :  { %361 = vst.msk [vmem:[%s1464_s3 + $0x30] sm:$0xff] %vm62_vm0, %v855_v10  ;;  %v285_v12 = vsel %vm283_vm13, %v284_v6, %v282_v11  ;;  %565 = vperm.xlu1 %811, %v841_v51  }
  0xea   :  { %v319_v13 = vadd.f32 1e-10, %v285_v12 }
  0xeb   :  { %v857_v14 = vpop.eup %856 }
  0xec   :  { %v859_v15 = vpop.eup %858  ;;  %364 = vst.msk [vmem:[%s1464_s3 + $0x48] sm:$0xff] %vm62_vm0, %v857_v14  ;;  %870 = vrcp.f32 %v319_v13  ;;  %595 = vperm.xlu0 %810, %v857_v14  }
  0xed   :  { %363 = vst.msk [vmem:[%s1464_s3 + $0x40] sm:$0xff] %vm62_vm0, %v859_v15  ;;  %570 = vperm.xlu1 %811, %v849_v2   ;;  %v861_v16 = vpop.eup %860 }
  0xee   :  { %v301_v19 = vmul.f32 %v861_v16, %v194_v0 }
  0xf0   :  { %v303_v22 = vsel %vm302_vm14, %v194_v0, %v301_v19 }
  0xf1   :  { %v863_v18 = vpop.eup %862  ;;  %575 = vperm.xlu1 %811, %v847_v1   ;;  %v306_v24 = vsel %vm304_vm15, %v305_v17, %v303_v22 }
  0xf2   :  { %v865_v20 = vpop.eup %864  ;;  %366 = vst.msk [vmem:[%s1464_s3 + $0x58] sm:$0xff] %vm62_vm0, %v863_v18  ;;  %605 = vperm.xlu0 %810, %v863_v18   ;;  %v322_v27 = vadd.f32 1e-10, %v306_v24 }
  0xf3   :  { %v867_v21 = vpop.eup %866  ;;  %365 = vst.msk [vmem:[%s1464_s3 + $0x50] sm:$0xff] %vm62_vm0, %v865_v20 }
  0xf4   :  { %v294_v25 = vmul.f32 %v867_v21, %v193_v60  ;;  %872 = vrcp.f32 %v322_v27 }
  0xf5   :  { %v869_v26 = vpop.eup %868  ;;  %580 = vperm.xlu1 %811, %v855_v10  }
  0xf6   :  { %368 = vst.msk [vmem:[%s1464_s3 + $0x68] sm:$0xff] %vm62_vm0, %v869_v26  ;;  %v296_v28 = vsel %vm295_vm1, %v193_v60, %v294_v25  ;;  %615 = vperm.xlu0 %810, %v869_v26  }
  0xf7   :  { %v299_v31 = vsel %vm297_vm2, %v298_v23, %v296_v28 }
  0xf8   :  { %v321_v32 = vadd.f32 1e-10, %v299_v31 }
  0xf9   :  { %v871_v33 = vpop.eup %870  ;;  %585 = vperm.xlu1 %811, %v853_v7  }
  0xfa   :  { %367 = vst.msk [vmem:[%s1464_s3 + $0x60] sm:$0xff] %vm62_vm0, %v871_v33  ;;  %874 = vrcp.f32 %v321_v32 }
  0xfd   :  { %590 = vperm.xlu1 %811, %v859_v15  }
 0x101   :  { %600 = vperm.xlu1 %811, %v865_v20   ;;  %v873_v34 = vpop.eup %872 }
 0x102   :  { %370 = vst.msk [vmem:[%s1464_s3 + $0x78] sm:$0xff] %vm62_vm0, %v873_v34  ;;  %625 = vperm.xlu0 %810, %v873_v34  }
 0x105   :  { %610 = vperm.xlu1 %811, %v871_v33  }
 0x107   :  { %v875_v35 = vpop.eup %874 }
 0x108   :  { %369 = vst.msk [vmem:[%s1464_s3 + $0x70] sm:$0xff] %vm62_vm0, %v875_v35  ;;  %s969_s3 = smov [#allocation8]  }
 0x109   :  { %620 = vperm.xlu1 %811, %v875_v35   ;;  %s667_s1 = sshll.u32 %s969_s3, 4  ;;  %s668_s1 = int_to_ptr.vmem [resolvable:$true] %s667_s1 }
 0x10a   :  { %s936_s30 = scalar_lea.vmem %s668_s1, 2048  ;;  %p941_p2 = scmp.lt.s32.totalorder %s668_s1, %s668_s1 }
 0x10b   :  { %p937_p1 = scmp.ne.s32.totalorder %s668_s1, %s936_s30  ;;  %p942_p3 = scmp.lt.s32.totalorder %s936_s30, %s936_s30 }
 0x10d   :  { %p943_p4 = por %p942_p3, %p941_p2 }
 0x10f   :  { %v748_v36 = vpop.f32.mrf.mxu0  ;;  %p944_p5 = pnand %p943_p4, %p937_p1 }
 0x111   :  { %v469_v37 = vpop.f32.mrf.mxu0  ;;  %v760_v42 = vpop.f32.mrf.mxu1 }
 0x113   :  { %v751_v39 = vpop.f32.mrf.mxu0  ;;  %v509_v47 = vpop.f32.mrf.mxu1 }
 0x115   :  { %v479_v41 = vpop.f32.mrf.mxu0  ;;  %v763_v51 = vpop.f32.mrf.mxu1 }
 0x117   :  { %v754_v46 = vpop.f32.mrf.mxu0  ;;  %v519_v56 = vpop.f32.mrf.mxu1 }
 0x119   :  { %v489_v50 = vpop.f32.mrf.mxu0  ;;  %v766_v0 = vpop.f32.mrf.mxu1 }
 0x11b   :  { %v757_v55 = vpop.f32.mrf.mxu0  ;;  %v529_v8 = vpop.f32.mrf.mxu1 }
 0x11d   :  { %v499_v63 = vpop.f32.mrf.mxu0  ;;  %v769_v10 = vpop.f32.mrf.mxu1 }
 0x11f   :  { %v539_v15 = vpop.f32.mrf.mxu1 }
 0x158   :  { %v551_v29 = vpop.permute.xlu0 %550 }
 0x159   :  { %v628_v38 = vmul.f32 %v551_v29, %v469_v37 }
 0x15b   :  { %644 = vst [vmem:[#allocation8] sm:$0xff] %v628_v38 }
 0x15c   :  { %v556_v40 = vpop.permute.xlu1 %555 }
 0x15d   :  { %v629_v30 = vmul.f32 %v748_v36, %v556_v40 }
 0x15f   :  { %645 = vst [vmem:[#allocation8 + $0x8] sm:$0xff] %v629_v30 }
 0x160   :  { %v561_v43 = vpop.permute.xlu1 %560 }
 0x161   :  { %v630_v44 = vmul.f32 %v561_v43, %v479_v41 }
 0x163   :  { %646 = vst [vmem:[#allocation8 + $0x10] sm:$0xff] %v630_v44 }
 0x164   :  { %v566_v48 = vpop.permute.xlu1 %565 }
 0x165   :  { %v631_v49 = vmul.f32 %v751_v39, %v566_v48 }
 0x167   :  { %647 = vst [vmem:[#allocation8 + $0x18] sm:$0xff] %v631_v49  ;;  %v596_v45 = vpop.permute.xlu0 %595 }
 0x168   :  { %v571_v52 = vpop.permute.xlu1 %570  ;;  %v637_v53 = vmul.f32 %v760_v42, %v596_v45 }
 0x169   :  { %v632_v54 = vmul.f32 %v571_v52, %v489_v50 }
 0x16a   :  { %653 = vst [vmem:[#allocation8 + $0x48] sm:$0xff] %v637_v53 }
 0x16b   :  { %648 = vst [vmem:[#allocation8 + $0x20] sm:$0xff] %v632_v54 }
 0x16c   :  { %v576_v57 = vpop.permute.xlu1 %575 }
 0x16d   :  { %v633_v59 = vmul.f32 %v754_v46, %v576_v57  ;;  %v606_v61 = vpop.permute.xlu0 %605 }
 0x16e   :  { %v639_v62 = vmul.f32 %v763_v51, %v606_v61 }
 0x16f   :  { %649 = vst [vmem:[#allocation8 + $0x28] sm:$0xff] %v633_v59 }
 0x170   :  { %655 = vst [vmem:[#allocation8 + $0x58] sm:$0xff] %v639_v62  ;;  %v581_v1 = vpop.permute.xlu1 %580 }
 0x171   :  { %v634_v58 = vmul.f32 %v581_v1, %v499_v63  ;;  %v616_v60 = vpop.permute.xlu0 %615 }
 0x172   :  { %v641_v2 = vmul.f32 %v766_v0, %v616_v60 }
 0x173   :  { %650 = vst [vmem:[#allocation8 + $0x30] sm:$0xff] %v634_v58 }
 0x174   :  { %657 = vst [vmem:[#allocation8 + $0x68] sm:$0xff] %v641_v2  ;;  %v586_v3 = vpop.permute.xlu1 %585 }
 0x175   :  { %v635_v4 = vmul.f32 %v757_v55, %v586_v3 }
 0x177   :  { %651 = vst [vmem:[#allocation8 + $0x38] sm:$0xff] %v635_v4 }
 0x178   :  { %v591_v5 = vpop.permute.xlu1 %590 }
 0x179   :  { %v636_v6 = vmul.f32 %v591_v5, %v509_v47 }
 0x17b   :  { %652 = vst [vmem:[#allocation8 + $0x40] sm:$0xff] %v636_v6 }
 0x17c   :  { %v601_v9 = vpop.permute.xlu1 %600 }
 0x17d   :  { %v638_v7 = vmul.f32 %v601_v9, %v519_v56  ;;  %v626_v11 = vpop.permute.xlu0 %625 }
 0x17e   :  { %v643_v13 = vmul.f32 %v769_v10, %v626_v11 }
 0x17f   :  { %654 = vst [vmem:[#allocation8 + $0x50] sm:$0xff] %v638_v7 }
 0x180   :  { %v611_v12 = vpop.permute.xlu1 %610  ;;  %659 = vst [vmem:[#allocation8 + $0x78] sm:$0xff] %v643_v13 }
 0x181   :  { %v640_v14 = vmul.f32 %v611_v12, %v529_v8 }
 0x183   :  { %656 = vst [vmem:[#allocation8 + $0x60] sm:$0xff] %v640_v14 }
 0x184   :  { %v621_v16 = vpop.permute.xlu1 %620 }
 0x185   :  { %v642_v17 = vmul.f32 %v621_v16, %v539_v15 }
 0x187   :  { %658 = vst [vmem:[#allocation8 + $0x70] sm:$0xff] %v642_v17 }
 0x188   :  { %947 = shalt.err (!%p944_p5)
}
 0x189   :  { %673 = dma.vmem_to_hbm [thread:$0]  %s668_s1, 2048, %s1465_s4, [#allocation4], %s964_s20, %s964_s20, %s965_s21  }
 0x18a   :  { %960 = dma.done.wait [#allocation4], 2048  }
 0x18b   :  { %961 = vsyncadd [#allocation4], 4294965248 }
 0x18c   :  { %679 = vsyncpa [#allocation3], 1 }
 0x18d   :  { %680 = vsyncpa [#allocation6], 1 }
 0x18e   :  { %681 = vsyncpa [#allocation4], 1 }

</bundles_post_ra>
